<compile_context>
chip_gen: v6e
topology: v6e:2x2x1
jax: 0.10.0
libtpu: 0.0.40
codegen_flags: <defaults>
</compile_context>

<pallas_src>
import jax
import jax.numpy as jnp
from jax.experimental import pallas as pl
from jax.experimental.pallas import tpu as pltpu


# ---------------------------------------------------------------------------
# Fused kernel: one-hot embedding/proj matmul -> layer-major RNN -> mean -> MLP
# ---------------------------------------------------------------------------
def make_senti_kernel(num_layers, seq, batch, hidden, vocab_p):
    sb = seq * batch

    def kernel(ids_ref, table_ref, *args):
        # args = [whh_0,
        #         (wih_l, bias_l, whh_l) for l = 1..num_layers-1,
        #         w1t, b1, w2t, b2, out_ref, hbuf_ref]
        whh_refs = [args[0]]
        wih_refs, bias_refs = [None], [None]
        pos = 1
        for _ in range(1, num_layers):
            wih_refs.append(args[pos])
            bias_refs.append(args[pos + 1])
            whh_refs.append(args[pos + 2])
            pos += 3
        w1_ref, b1_ref, w2_ref, b2_ref, out_ref, hbuf_ref = args[pos:pos + 6]

        # ---- Embedding gather fused with layer-0 input projection:
        # one-hot(ids) @ (emb @ W_ih0^T + b_ih0 + b_hh0)  ->  (seq*batch, hidden)
        # in a single MXU matmul.  Padded table rows are zero, so the lane padding of
        # the one-hot K dim is exact.
        ids = ids_ref[...]                                             # (sb, 1) int32
        iota = jax.lax.broadcasted_iota(jnp.int32, (sb, vocab_p), 1)
        onehot = (ids == iota).astype(jnp.bfloat16)                    # (sb, vocab_p)
        xproj = jnp.dot(onehot, table_ref[...],
                        preferred_element_type=jnp.float32)            # f32, bias folded

        h_final_sum = jnp.zeros((batch, hidden), jnp.float32)

        for l in range(num_layers):
            last = (l == num_layers - 1)
            w_hh = whh_refs[l][...]            # bf16 (hidden, hidden), read once/layer

            # Sequential recurrence: only tanh(x_proj[t] + h @ W_hh) on the chain.
            h = jnp.zeros((batch, hidden), jnp.float32)
            for t in range(seq):               # static unroll (seq short & static)
                x_t = xproj[t * batch:(t + 1) * batch, :]              # (batch, hidden)
                z = x_t + jnp.dot(h.astype(jnp.bfloat16), w_hh,
                                  preferred_element_type=jnp.float32)
                h = jnp.tanh(z)                                        # f32 epilogue
                if not last:
                    hbuf_ref[pl.ds(t * batch, batch), :] = h

            h_final_sum = h_final_sum + h

            if not last:
                # Next layer's input projections for ALL timesteps: one batched matmul.
                acts = hbuf_ref[...].astype(jnp.bfloat16)              # (sb, hidden)
                xproj = (jnp.dot(acts, wih_refs[l + 1][...],
                                 preferred_element_type=jnp.float32)
                         + bias_refs[l + 1][...])

        # ---- Head: mean over layer final states -> Linear -> ReLU -> Linear.
        h_mean = h_final_sum * (1.0 / float(num_layers))               # (batch, hidden)
        h1 = (jnp.dot(h_mean.astype(jnp.bfloat16), w1_ref[...],
                      preferred_element_type=jnp.float32) + b1_ref[...])
        h1 = jnp.maximum(h1, 0.0)                                      # ReLU (f32)
        h2 = (jnp.dot(h1.astype(jnp.bfloat16), w2_ref[...],
                      preferred_element_type=jnp.float32) + b2_ref[...])
        out_ref[...] = h2.astype(out_ref.dtype)

    return kernel


# ---------------------------------------------------------------------------
# One-time weight preparation (NOT per call)
# ---------------------------------------------------------------------------
def prepare_params(params):
    emb = params["embedding"].astype(jnp.float32)            # (vocab, emb)
    rnn = params["rnn"]
    num_layers = len(rnn)
    hidden = rnn[0][0].shape[0]
    vocab = emb.shape[0]
    vocab_p = ((vocab + 127) // 128) * 128                   # lane-align one-hot K dim

    w_ih0, _, b_ih0, b_hh0 = rnn[0]
    # Fold the embedding table through layer 0's input weights + both biases.
    table = emb @ w_ih0.T + (b_ih0 + b_hh0)[None, :]         # (vocab, hidden) f32
    table = jnp.pad(table, ((0, vocab_p - vocab), (0, 0)))   # zero rows: exact K pad

    return {
        "table_proj": table.astype(jnp.bfloat16),                         # (vocab_p, hidden)
        "whh": tuple(w_hh.T.astype(jnp.bfloat16) for (_, w_hh, _, _) in rnn),
        "wih": tuple(rnn[l][0].T.astype(jnp.bfloat16) for l in range(1, num_layers)),
        "bias": tuple((rnn[l][2] + rnn[l][3]).reshape(1, hidden).astype(jnp.float32)
                      for l in range(1, num_layers)),
        "w1t": params["w1"].T.astype(jnp.bfloat16),                       # (hidden, hidden)
        "b1": params["b1"].reshape(1, -1).astype(jnp.float32),            # (1, hidden)
        "w2t": params["w2"].T.astype(jnp.bfloat16),                       # (hidden, 2)
        "b2": params["b2"].reshape(1, -1).astype(jnp.float32),            # (1, 2)
    }


# ---------------------------------------------------------------------------
# Per-call forward (only ids flattening + the fused kernel launch)
# ---------------------------------------------------------------------------
@jax.jit
def senti_model_forward(input_batch, prepped):
    batch, seq = input_batch.shape
    vocab_p, hidden = prepped["table_proj"].shape
    num_layers = len(prepped["whh"])

    # seq-major flat ids: row t*batch + b holds input_batch[b, t]  (tiny per-call op).
    ids = input_batch.astype(jnp.int32).T.reshape(seq * batch, 1)

    vmem = pl.BlockSpec(memory_space=pltpu.MemorySpace.VMEM)

    kernel_args = [ids, prepped["table_proj"], prepped["whh"][0]]
    for l in range(1, num_layers):
        kernel_args += [prepped["wih"][l - 1], prepped["bias"][l - 1], prepped["whh"][l]]
    kernel_args += [prepped["w1t"], prepped["b1"], prepped["w2t"], prepped["b2"]]

    kernel = make_senti_kernel(num_layers, seq, batch, hidden, vocab_p)
    return pl.pallas_call(
        kernel,
        out_shape=jax.ShapeDtypeStruct((batch, 2), jnp.float32),
        in_specs=[vmem] * len(kernel_args),
        out_specs=vmem,
        scratch_shapes=[pltpu.VMEM((seq * batch, hidden), jnp.float32)],  # layer acts (~2 KB)
    )(*kernel_args)


# ---------------------------------------------------------------------------
# Pure-JAX float32 reference (mirrors SentiModel.forward, eval mode)
# ---------------------------------------------------------------------------
def senti_reference(input_batch, params):
    emb = params["embedding"]
    x = jnp.transpose(emb[input_batch], (1, 0, 2))           # (seq, batch, emb)
    finals = []
    layer_in = x
    for (w_ih, w_hh, b_ih, b_hh) in params["rnn"]:
        h = jnp.zeros((x.shape[1], w_hh.shape[0]), jnp.float32)
        outs = []
        for t in range(layer_in.shape[0]):
            h = jnp.tanh(layer_in[t] @ w_ih.T + b_ih + h @ w_hh.T + b_hh)
            outs.append(h)
        layer_in = jnp.stack(outs, axis=0)
        finals.append(h)
    hn = jnp.stack(finals, axis=0).mean(axis=0)               # mean over layer finals
    h1 = jnp.maximum(hn @ params["w1"].T + params["b1"], 0.0)
    return h1 @ params["w2"].T + params["b2"]


# ---------------------------------------------------------------------------
# Deterministic parameter init (PyTorch-like uniform(-1/sqrt(h), 1/sqrt(h)))
# ---------------------------------------------------------------------------
def init_params(key, vocab_size, input_size, hidden_size, rnn_layers):
    keys = iter(jax.random.split(key, 4 + 4 * rnn_layers + 4))
    scale = 1.0 / jnp.sqrt(hidden_size)

    def u(k, shape, s):
        return jax.random.uniform(k, shape, jnp.float32, -s, s)

    params = {}
    params["embedding"] = jax.random.normal(next(keys), (vocab_size, input_size),
                                            jnp.float32)
    rnn = []
    in_feat = input_size
    for _ in range(rnn_layers):
        w_ih = u(next(keys), (hidden_size, in_feat), scale)
        w_hh = u(next(keys), (hidden_size, hidden_size), scale)
        b_ih = u(next(keys), (hidden_size,), scale)
        b_hh = u(next(keys), (hidden_size,), scale)
        rnn.append((w_ih, w_hh, b_ih, b_hh))
        in_feat = hidden_size
    params["rnn"] = rnn
    params["w1"] = u(next(keys), (hidden_size, hidden_size), scale)
    params["b1"] = u(next(keys), (hidden_size,), scale)
    params["w2"] = u(next(keys), (2, hidden_size), scale)
    params["b2"] = u(next(keys), (2,), scale)
    return params


if __name__ == "__main__":
    # Small shapes consistent with the module.
    vocab_size = 50
    input_size = 32      # embedding dim
    hidden_size = 32
    rnn_layers = 2
    batch = 2
    seq = 8

    key = jax.random.PRNGKey(0)
    k_params, k_inp = jax.random.split(key)
    params = init_params(k_params, vocab_size, input_size, hidden_size, rnn_layers)
    input_batch = jax.random.randint(k_inp, (batch, seq), 0, vocab_size,
                                     dtype=jnp.int32)

    prepped = prepare_params(params)             # one-time weight prep (hoisted)

    out = senti_model_forward(input_batch, prepped)
    out = jax.block_until_ready(out)
    assert out.shape == (batch, 2), out.shape

    ref = senti_reference(input_batch, params)
    max_diff = float(jnp.max(jnp.abs(out - ref)))
    assert max_diff == max_diff, "NaN in kernel output"      # NaN guard
    assert max_diff < 0.2, f"kernel/reference mismatch: max |diff| = {max_diff}"

    print("KERNEL_OK")
</pallas_src>

<mosaic_0001>
module attributes {stable_mosaic.version = 11 : i64} {
  func.func @kernel(%arg0: memref<16x1xi32, #tpu.memory_space<vmem>>, %arg1: memref<128x32xbf16, #tpu.memory_space<vmem>>, %arg2: memref<32x32xbf16, #tpu.memory_space<vmem>>, %arg3: memref<32x32xbf16, #tpu.memory_space<vmem>>, %arg4: memref<1x32xf32, #tpu.memory_space<vmem>>, %arg5: memref<32x32xbf16, #tpu.memory_space<vmem>>, %arg6: memref<32x32xbf16, #tpu.memory_space<vmem>>, %arg7: memref<1x32xf32, #tpu.memory_space<vmem>>, %arg8: memref<32x2xbf16, #tpu.memory_space<vmem>>, %arg9: memref<1x2xf32, #tpu.memory_space<vmem>>, %arg10: memref<2x2xf32, #tpu.memory_space<vmem>>, %arg11: memref<16x32xf32, #tpu.memory_space<vmem>>) attributes {dimension_semantics = [], scalar_prefetch = 0 : i64, scratch_operands = 1 : i64, tpu.core_type = #tpu.core_type<tc>} {
    %c0 = arith.constant 0 : index
    %c0_0 = arith.constant 0 : index
    %0 = vector.load %arg0[%c0, %c0_0] : memref<16x1xi32, #tpu.memory_space<vmem>>, vector<16x1xi32>
    %1 = tpu.iota {dimensions = array<i32: 1>} : vector<16x128xi32>
    %2 = vector.broadcast %0 : vector<16x1xi32> to vector<16x128xi32>
    %3 = arith.cmpi eq, %2, %1 : vector<16x128xi32>
    %4 = arith.extui %3 : vector<16x128xi1> to vector<16x128xi32>
    %5 = arith.sitofp %4 : vector<16x128xi32> to vector<16x128xf32>
    %6 = arith.truncf %5 : vector<16x128xf32> to vector<16x128xbf16>
    %c0_1 = arith.constant 0 : index
    %c0_2 = arith.constant 0 : index
    %7 = vector.load %arg1[%c0_1, %c0_2] : memref<128x32xbf16, #tpu.memory_space<vmem>>, vector<128x32xbf16>
    %cst = arith.constant dense<0.000000e+00> : vector<16x32xf32>
    %8 = tpu.matmul %6, %7, %cst {dimension_numbers = #tpu.dot_dimension_numbers<[1], [0], [0], [1], [0, 0, 1, 1], [], []>} : vector<16x128xbf16>, vector<128x32xbf16>, vector<16x32xf32> -> vector<16x32xf32>
    %cst_3 = arith.constant 0.000000e+00 : f32
    %9 = vector.broadcast %cst_3 : f32 to vector<2x32xf32>
    %c0_4 = arith.constant 0 : index
    %c0_5 = arith.constant 0 : index
    %10 = vector.load %arg2[%c0_4, %c0_5] : memref<32x32xbf16, #tpu.memory_space<vmem>>, vector<32x32xbf16>
    %cst_6 = arith.constant 0.000000e+00 : f32
    %11 = vector.broadcast %cst_6 : f32 to vector<2x32xf32>
    %12 = vector.extract_strided_slice %8 {offsets = [0, 0], sizes = [2, 32], strides = [1, 1]} : vector<16x32xf32> to vector<2x32xf32>
    %13 = arith.truncf %11 : vector<2x32xf32> to vector<2x32xbf16>
    %cst_7 = arith.constant dense<0.000000e+00> : vector<2x32xf32>
    %14 = tpu.matmul %13, %10, %cst_7 {dimension_numbers = #tpu.dot_dimension_numbers<[1], [0], [0], [1], [0, 0, 1, 1], [], []>} : vector<2x32xbf16>, vector<32x32xbf16>, vector<2x32xf32> -> vector<2x32xf32>
    %15 = arith.addf %12, %14 : vector<2x32xf32>
    %16 = math.tanh %15 : vector<2x32xf32>
    %c0_8 = arith.constant 0 : index
    %c0_9 = arith.constant 0 : index
    %17 = vector.load %arg11[%c0_8, %c0_9] : memref<16x32xf32, #tpu.memory_space<vmem>>, vector<2x32xf32>
    tpu.vector_store %arg11[%c0_8, %c0_9], %16 {strides = array<i32>} : memref<16x32xf32, #tpu.memory_space<vmem>>, vector<2x32xf32>,
    %18 = vector.extract_strided_slice %8 {offsets = [2, 0], sizes = [2, 32], strides = [1, 1]} : vector<16x32xf32> to vector<2x32xf32>
    %19 = arith.truncf %16 : vector<2x32xf32> to vector<2x32xbf16>
    %cst_10 = arith.constant dense<0.000000e+00> : vector<2x32xf32>
    %20 = tpu.matmul %19, %10, %cst_10 {dimension_numbers = #tpu.dot_dimension_numbers<[1], [0], [0], [1], [0, 0, 1, 1], [], []>} : vector<2x32xbf16>, vector<32x32xbf16>, vector<2x32xf32> -> vector<2x32xf32>
    %21 = arith.addf %18, %20 : vector<2x32xf32>
    %22 = math.tanh %21 : vector<2x32xf32>
    %c2 = arith.constant 2 : index
    %c0_11 = arith.constant 0 : index
    %23 = vector.load %arg11[%c2, %c0_11] : memref<16x32xf32, #tpu.memory_space<vmem>>, vector<2x32xf32>
    tpu.vector_store %arg11[%c2, %c0_11], %22 {strides = array<i32>} : memref<16x32xf32, #tpu.memory_space<vmem>>, vector<2x32xf32>,
    %24 = vector.extract_strided_slice %8 {offsets = [4, 0], sizes = [2, 32], strides = [1, 1]} : vector<16x32xf32> to vector<2x32xf32>
    %25 = arith.truncf %22 : vector<2x32xf32> to vector<2x32xbf16>
    %cst_12 = arith.constant dense<0.000000e+00> : vector<2x32xf32>
    %26 = tpu.matmul %25, %10, %cst_12 {dimension_numbers = #tpu.dot_dimension_numbers<[1], [0], [0], [1], [0, 0, 1, 1], [], []>} : vector<2x32xbf16>, vector<32x32xbf16>, vector<2x32xf32> -> vector<2x32xf32>
    %27 = arith.addf %24, %26 : vector<2x32xf32>
    %28 = math.tanh %27 : vector<2x32xf32>
    %c4 = arith.constant 4 : index
    %c0_13 = arith.constant 0 : index
    %29 = vector.load %arg11[%c4, %c0_13] : memref<16x32xf32, #tpu.memory_space<vmem>>, vector<2x32xf32>
    tpu.vector_store %arg11[%c4, %c0_13], %28 {strides = array<i32>} : memref<16x32xf32, #tpu.memory_space<vmem>>, vector<2x32xf32>,
    %30 = vector.extract_strided_slice %8 {offsets = [6, 0], sizes = [2, 32], strides = [1, 1]} : vector<16x32xf32> to vector<2x32xf32>
    %31 = arith.truncf %28 : vector<2x32xf32> to vector<2x32xbf16>
    %cst_14 = arith.constant dense<0.000000e+00> : vector<2x32xf32>
    %32 = tpu.matmul %31, %10, %cst_14 {dimension_numbers = #tpu.dot_dimension_numbers<[1], [0], [0], [1], [0, 0, 1, 1], [], []>} : vector<2x32xbf16>, vector<32x32xbf16>, vector<2x32xf32> -> vector<2x32xf32>
    %33 = arith.addf %30, %32 : vector<2x32xf32>
    %34 = math.tanh %33 : vector<2x32xf32>
    %c6 = arith.constant 6 : index
    %c0_15 = arith.constant 0 : index
    %35 = vector.load %arg11[%c6, %c0_15] : memref<16x32xf32, #tpu.memory_space<vmem>>, vector<2x32xf32>
    tpu.vector_store %arg11[%c6, %c0_15], %34 {strides = array<i32>} : memref<16x32xf32, #tpu.memory_space<vmem>>, vector<2x32xf32>,
    %36 = vector.extract_strided_slice %8 {offsets = [8, 0], sizes = [2, 32], strides = [1, 1]} : vector<16x32xf32> to vector<2x32xf32>
    %37 = arith.truncf %34 : vector<2x32xf32> to vector<2x32xbf16>
    %cst_16 = arith.constant dense<0.000000e+00> : vector<2x32xf32>
    %38 = tpu.matmul %37, %10, %cst_16 {dimension_numbers = #tpu.dot_dimension_numbers<[1], [0], [0], [1], [0, 0, 1, 1], [], []>} : vector<2x32xbf16>, vector<32x32xbf16>, vector<2x32xf32> -> vector<2x32xf32>
    %39 = arith.addf %36, %38 : vector<2x32xf32>
    %40 = math.tanh %39 : vector<2x32xf32>
    %c8 = arith.constant 8 : index
    %c0_17 = arith.constant 0 : index
    %41 = vector.load %arg11[%c8, %c0_17] : memref<16x32xf32, #tpu.memory_space<vmem>>, vector<2x32xf32>
    tpu.vector_store %arg11[%c8, %c0_17], %40 {strides = array<i32>} : memref<16x32xf32, #tpu.memory_space<vmem>>, vector<2x32xf32>,
    %42 = vector.extract_strided_slice %8 {offsets = [10, 0], sizes = [2, 32], strides = [1, 1]} : vector<16x32xf32> to vector<2x32xf32>
    %43 = arith.truncf %40 : vector<2x32xf32> to vector<2x32xbf16>
    %cst_18 = arith.constant dense<0.000000e+00> : vector<2x32xf32>
    %44 = tpu.matmul %43, %10, %cst_18 {dimension_numbers = #tpu.dot_dimension_numbers<[1], [0], [0], [1], [0, 0, 1, 1], [], []>} : vector<2x32xbf16>, vector<32x32xbf16>, vector<2x32xf32> -> vector<2x32xf32>
    %45 = arith.addf %42, %44 : vector<2x32xf32>
    %46 = math.tanh %45 : vector<2x32xf32>
    %c10 = arith.constant 10 : index
    %c0_19 = arith.constant 0 : index
    %47 = vector.load %arg11[%c10, %c0_19] : memref<16x32xf32, #tpu.memory_space<vmem>>, vector<2x32xf32>
    tpu.vector_store %arg11[%c10, %c0_19], %46 {strides = array<i32>} : memref<16x32xf32, #tpu.memory_space<vmem>>, vector<2x32xf32>,
    %48 = vector.extract_strided_slice %8 {offsets = [12, 0], sizes = [2, 32], strides = [1, 1]} : vector<16x32xf32> to vector<2x32xf32>
    %49 = arith.truncf %46 : vector<2x32xf32> to vector<2x32xbf16>
    %cst_20 = arith.constant dense<0.000000e+00> : vector<2x32xf32>
    %50 = tpu.matmul %49, %10, %cst_20 {dimension_numbers = #tpu.dot_dimension_numbers<[1], [0], [0], [1], [0, 0, 1, 1], [], []>} : vector<2x32xbf16>, vector<32x32xbf16>, vector<2x32xf32> -> vector<2x32xf32>
    %51 = arith.addf %48, %50 : vector<2x32xf32>
    %52 = math.tanh %51 : vector<2x32xf32>
    %c12 = arith.constant 12 : index
    %c0_21 = arith.constant 0 : index
    %53 = vector.load %arg11[%c12, %c0_21] : memref<16x32xf32, #tpu.memory_space<vmem>>, vector<2x32xf32>
    tpu.vector_store %arg11[%c12, %c0_21], %52 {strides = array<i32>} : memref<16x32xf32, #tpu.memory_space<vmem>>, vector<2x32xf32>,
    %54 = vector.extract_strided_slice %8 {offsets = [14, 0], sizes = [2, 32], strides = [1, 1]} : vector<16x32xf32> to vector<2x32xf32>
    %55 = arith.truncf %52 : vector<2x32xf32> to vector<2x32xbf16>
    %cst_22 = arith.constant dense<0.000000e+00> : vector<2x32xf32>
    %56 = tpu.matmul %55, %10, %cst_22 {dimension_numbers = #tpu.dot_dimension_numbers<[1], [0], [0], [1], [0, 0, 1, 1], [], []>} : vector<2x32xbf16>, vector<32x32xbf16>, vector<2x32xf32> -> vector<2x32xf32>
    %57 = arith.addf %54, %56 : vector<2x32xf32>
    %58 = math.tanh %57 : vector<2x32xf32>
    %c14 = arith.constant 14 : index
    %c0_23 = arith.constant 0 : index
    %59 = vector.load %arg11[%c14, %c0_23] : memref<16x32xf32, #tpu.memory_space<vmem>>, vector<2x32xf32>
    tpu.vector_store %arg11[%c14, %c0_23], %58 {strides = array<i32>} : memref<16x32xf32, #tpu.memory_space<vmem>>, vector<2x32xf32>,
    %60 = arith.addf %9, %58 : vector<2x32xf32>
    %c0_24 = arith.constant 0 : index
    %c0_25 = arith.constant 0 : index
    %61 = vector.load %arg11[%c0_24, %c0_25] : memref<16x32xf32, #tpu.memory_space<vmem>>, vector<16x32xf32>
    %62 = arith.truncf %61 : vector<16x32xf32> to vector<16x32xbf16>
    %c0_26 = arith.constant 0 : index
    %c0_27 = arith.constant 0 : index
    %63 = vector.load %arg3[%c0_26, %c0_27] : memref<32x32xbf16, #tpu.memory_space<vmem>>, vector<32x32xbf16>
    %cst_28 = arith.constant dense<0.000000e+00> : vector<16x32xf32>
    %64 = tpu.matmul %62, %63, %cst_28 {dimension_numbers = #tpu.dot_dimension_numbers<[1], [0], [0], [1], [0, 0, 1, 1], [], []>} : vector<16x32xbf16>, vector<32x32xbf16>, vector<16x32xf32> -> vector<16x32xf32>
    %c0_29 = arith.constant 0 : index
    %c0_30 = arith.constant 0 : index
    %65 = vector.load %arg4[%c0_29, %c0_30] : memref<1x32xf32, #tpu.memory_space<vmem>>, vector<1x32xf32>
    %66 = vector.broadcast %65 : vector<1x32xf32> to vector<16x32xf32>
    %67 = arith.addf %64, %66 : vector<16x32xf32>
    %c0_31 = arith.constant 0 : index
    %c0_32 = arith.constant 0 : index
    %68 = vector.load %arg5[%c0_31, %c0_32] : memref<32x32xbf16, #tpu.memory_space<vmem>>, vector<32x32xbf16>
    %cst_33 = arith.constant 0.000000e+00 : f32
    %69 = vector.broadcast %cst_33 : f32 to vector<2x32xf32>
    %70 = vector.extract_strided_slice %67 {offsets = [0, 0], sizes = [2, 32], strides = [1, 1]} : vector<16x32xf32> to vector<2x32xf32>
    %71 = arith.truncf %69 : vector<2x32xf32> to vector<2x32xbf16>
    %cst_34 = arith.constant dense<0.000000e+00> : vector<2x32xf32>
    %72 = tpu.matmul %71, %68, %cst_34 {dimension_numbers = #tpu.dot_dimension_numbers<[1], [0], [0], [1], [0, 0, 1, 1], [], []>} : vector<2x32xbf16>, vector<32x32xbf16>, vector<2x32xf32> -> vector<2x32xf32>
    %73 = arith.addf %70, %72 : vector<2x32xf32>
    %74 = math.tanh %73 : vector<2x32xf32>
    %75 = vector.extract_strided_slice %67 {offsets = [2, 0], sizes = [2, 32], strides = [1, 1]} : vector<16x32xf32> to vector<2x32xf32>
    %76 = arith.truncf %74 : vector<2x32xf32> to vector<2x32xbf16>
    %cst_35 = arith.constant dense<0.000000e+00> : vector<2x32xf32>
    %77 = tpu.matmul %76, %68, %cst_35 {dimension_numbers = #tpu.dot_dimension_numbers<[1], [0], [0], [1], [0, 0, 1, 1], [], []>} : vector<2x32xbf16>, vector<32x32xbf16>, vector<2x32xf32> -> vector<2x32xf32>
    %78 = arith.addf %75, %77 : vector<2x32xf32>
    %79 = math.tanh %78 : vector<2x32xf32>
    %80 = vector.extract_strided_slice %67 {offsets = [4, 0], sizes = [2, 32], strides = [1, 1]} : vector<16x32xf32> to vector<2x32xf32>
    %81 = arith.truncf %79 : vector<2x32xf32> to vector<2x32xbf16>
    %cst_36 = arith.constant dense<0.000000e+00> : vector<2x32xf32>
    %82 = tpu.matmul %81, %68, %cst_36 {dimension_numbers = #tpu.dot_dimension_numbers<[1], [0], [0], [1], [0, 0, 1, 1], [], []>} : vector<2x32xbf16>, vector<32x32xbf16>, vector<2x32xf32> -> vector<2x32xf32>
    %83 = arith.addf %80, %82 : vector<2x32xf32>
    %84 = math.tanh %83 : vector<2x32xf32>
    %85 = vector.extract_strided_slice %67 {offsets = [6, 0], sizes = [2, 32], strides = [1, 1]} : vector<16x32xf32> to vector<2x32xf32>
    %86 = arith.truncf %84 : vector<2x32xf32> to vector<2x32xbf16>
    %cst_37 = arith.constant dense<0.000000e+00> : vector<2x32xf32>
    %87 = tpu.matmul %86, %68, %cst_37 {dimension_numbers = #tpu.dot_dimension_numbers<[1], [0], [0], [1], [0, 0, 1, 1], [], []>} : vector<2x32xbf16>, vector<32x32xbf16>, vector<2x32xf32> -> vector<2x32xf32>
    %88 = arith.addf %85, %87 : vector<2x32xf32>
    %89 = math.tanh %88 : vector<2x32xf32>
    %90 = vector.extract_strided_slice %67 {offsets = [8, 0], sizes = [2, 32], strides = [1, 1]} : vector<16x32xf32> to vector<2x32xf32>
    %91 = arith.truncf %89 : vector<2x32xf32> to vector<2x32xbf16>
    %cst_38 = arith.constant dense<0.000000e+00> : vector<2x32xf32>
    %92 = tpu.matmul %91, %68, %cst_38 {dimension_numbers = #tpu.dot_dimension_numbers<[1], [0], [0], [1], [0, 0, 1, 1], [], []>} : vector<2x32xbf16>, vector<32x32xbf16>, vector<2x32xf32> -> vector<2x32xf32>
    %93 = arith.addf %90, %92 : vector<2x32xf32>
    %94 = math.tanh %93 : vector<2x32xf32>
    %95 = vector.extract_strided_slice %67 {offsets = [10, 0], sizes = [2, 32], strides = [1, 1]} : vector<16x32xf32> to vector<2x32xf32>
    %96 = arith.truncf %94 : vector<2x32xf32> to vector<2x32xbf16>
    %cst_39 = arith.constant dense<0.000000e+00> : vector<2x32xf32>
    %97 = tpu.matmul %96, %68, %cst_39 {dimension_numbers = #tpu.dot_dimension_numbers<[1], [0], [0], [1], [0, 0, 1, 1], [], []>} : vector<2x32xbf16>, vector<32x32xbf16>, vector<2x32xf32> -> vector<2x32xf32>
    %98 = arith.addf %95, %97 : vector<2x32xf32>
    %99 = math.tanh %98 : vector<2x32xf32>
    %100 = vector.extract_strided_slice %67 {offsets = [12, 0], sizes = [2, 32], strides = [1, 1]} : vector<16x32xf32> to vector<2x32xf32>
    %101 = arith.truncf %99 : vector<2x32xf32> to vector<2x32xbf16>
    %cst_40 = arith.constant dense<0.000000e+00> : vector<2x32xf32>
    %102 = tpu.matmul %101, %68, %cst_40 {dimension_numbers = #tpu.dot_dimension_numbers<[1], [0], [0], [1], [0, 0, 1, 1], [], []>} : vector<2x32xbf16>, vector<32x32xbf16>, vector<2x32xf32> -> vector<2x32xf32>
    %103 = arith.addf %100, %102 : vector<2x32xf32>
    %104 = math.tanh %103 : vector<2x32xf32>
    %105 = vector.extract_strided_slice %67 {offsets = [14, 0], sizes = [2, 32], strides = [1, 1]} : vector<16x32xf32> to vector<2x32xf32>
    %106 = arith.truncf %104 : vector<2x32xf32> to vector<2x32xbf16>
    %cst_41 = arith.constant dense<0.000000e+00> : vector<2x32xf32>
    %107 = tpu.matmul %106, %68, %cst_41 {dimension_numbers = #tpu.dot_dimension_numbers<[1], [0], [0], [1], [0, 0, 1, 1], [], []>} : vector<2x32xbf16>, vector<32x32xbf16>, vector<2x32xf32> -> vector<2x32xf32>
    %108 = arith.addf %105, %107 : vector<2x32xf32>
    %109 = math.tanh %108 : vector<2x32xf32>
    %110 = arith.addf %60, %109 : vector<2x32xf32>
    %cst_42 = arith.constant 5.000000e-01 : f32
    %111 = vector.broadcast %cst_42 : f32 to vector<2x32xf32>
    %112 = arith.mulf %110, %111 : vector<2x32xf32>
    %113 = arith.truncf %112 : vector<2x32xf32> to vector<2x32xbf16>
    %c0_43 = arith.constant 0 : index
    %c0_44 = arith.constant 0 : index
    %114 = vector.load %arg6[%c0_43, %c0_44] : memref<32x32xbf16, #tpu.memory_space<vmem>>, vector<32x32xbf16>
    %cst_45 = arith.constant dense<0.000000e+00> : vector<2x32xf32>
    %115 = tpu.matmul %113, %114, %cst_45 {dimension_numbers = #tpu.dot_dimension_numbers<[1], [0], [0], [1], [0, 0, 1, 1], [], []>} : vector<2x32xbf16>, vector<32x32xbf16>, vector<2x32xf32> -> vector<2x32xf32>
    %c0_46 = arith.constant 0 : index
    %c0_47 = arith.constant 0 : index
    %116 = vector.load %arg7[%c0_46, %c0_47] : memref<1x32xf32, #tpu.memory_space<vmem>>, vector<1x32xf32>
    %117 = vector.broadcast %116 : vector<1x32xf32> to vector<2x32xf32>
    %118 = arith.addf %115, %117 : vector<2x32xf32>
    %cst_48 = arith.constant 0.000000e+00 : f32
    %119 = vector.broadcast %cst_48 : f32 to vector<2x32xf32>
    %120 = arith.maximumf %118, %119 : vector<2x32xf32>
    %121 = arith.truncf %120 : vector<2x32xf32> to vector<2x32xbf16>
    %c0_49 = arith.constant 0 : index
    %c0_50 = arith.constant 0 : index
    %122 = vector.load %arg8[%c0_49, %c0_50] : memref<32x2xbf16, #tpu.memory_space<vmem>>, vector<32x2xbf16>
    %cst_51 = arith.constant dense<0.000000e+00> : vector<2x2xf32>
    %123 = tpu.matmul %121, %122, %cst_51 {dimension_numbers = #tpu.dot_dimension_numbers<[1], [0], [0], [1], [0, 0, 1, 1], [], []>} : vector<2x32xbf16>, vector<32x2xbf16>, vector<2x2xf32> -> vector<2x2xf32>
    %c0_52 = arith.constant 0 : index
    %c0_53 = arith.constant 0 : index
    %124 = vector.load %arg9[%c0_52, %c0_53] : memref<1x2xf32, #tpu.memory_space<vmem>>, vector<1x2xf32>
    %125 = vector.broadcast %124 : vector<1x2xf32> to vector<2x2xf32>
    %126 = arith.addf %123, %125 : vector<2x2xf32>
    %c0_54 = arith.constant 0 : index
    %c0_55 = arith.constant 0 : index
    %127 = vector.load %arg10[%c0_54, %c0_55] : memref<2x2xf32, #tpu.memory_space<vmem>>, vector<2x2xf32>
    tpu.vector_store %arg10[%c0_54, %c0_55], %126 {strides = array<i32>} : memref<2x2xf32, #tpu.memory_space<vmem>>, vector<2x2xf32>,
    return
  }
}

</mosaic_0001>

<bundles_post_ra>
// kernel: senti_model_forward.1
= control target key start
LH: loop header
LB: loop body
LE: loop exit
PB: predicated region body
PF: predicated region fallthrough
CT: control target
= control target key end

     0   :  { %v1575_v1 = vmov 0   ;;  %v1576_v2 = vmov 0.0   ;;  %vm1577_vm0 = vmmov 0   ;;  %s1877_s0 = inlined_call_operand.vmem [shape: s32[16,1], index: 0, kind: input, shape index: {}]   ;;  %s1878_s1 = inlined_call_operand.vmem [shape: bf16[128,32], index: 1, kind: input, shape index: {}]   ;;  %s1879_s2 = inlined_call_operand.vmem [shape: bf16[32,32], index: 2, kind: input, shape index: {}]   ;;  %s1880_s3 = inlined_call_operand.vmem [shape: bf16[32,32], index: 3, kind: input, shape index: {}]   ;;  %s1881_s4 = inlined_call_operand.vmem [shape: f32[1,32], index: 4, kind: input, shape index: {}]   ;;  %s1882_s5 = inlined_call_operand.vmem [shape: bf16[32,32], index: 5, kind: input, shape index: {}]   ;;  %s1883_s6 = inlined_call_operand.vmem [shape: bf16[32,32], index: 6, kind: input, shape index: {}]   ;;  %s1884_s7 = inlined_call_operand.vmem [shape: f32[1,32], index: 7, kind: input, shape index: {}]   ;;  %s1885_s8 = inlined_call_operand.vmem [shape: bf16[32,2], index: 8, kind: input, shape index: {}]   ;;  %s1886_s9 = inlined_call_operand.vmem [shape: f32[1,2], index: 9, kind: input, shape index: {}]   ;;  %s1887_s10 = inlined_call_operand.hbm [shape: f32[2,2], index: 10, kind: output, shape index: {}]  }
   0x1   :  { %v37_v0 = vld [vmem:[%s1877_s0] sm:$0xff]  ;;  %1502 = vset.pattern.permute.xlu0 %v1575_v1  ;;  %1325 = vmatprep.subr.bf16.mxu0 %v1576_v2  ;;  %v1503_v3 = vld [vmem:[%s1878_s1 + $0x38] sm:$0xff]   ;;  %v38_v4 = vld [vmem:[%s1877_s0 + $0x8] sm:$0xff] }
   0x2   :  { %42 = vperm.xlu0 %1502, %v37_v0   ;;  %1345 = vmatprep.subr.bf16.mxu1 %v1576_v2  ;;  %v1504_v5 = vld [vmem:[%s1878_s1 + $0x30] sm:$0xff]   ;;  %v1658_v6 = vld [vmem:[%s1879_s2 + $0x8] sm:$0xff]   ;;  %v1668_v8 = vld [vmem:[%s1879_s2] sm:$0xff]  }
   0x3   :  { %1326 = vmatpush3.bf16.msra.mxu0 %v1503_v3  ;;  %1349 = vmatprep.mubr.msk.bf16.mxu1 %vm1577_vm0, %v1576_v2  ;;  %v1505_v7 = vld [vmem:[%s1878_s1 + $0x28] sm:$0xff]   ;;  %v1506_v9 = vld [vmem:[%s1878_s1 + $0x20] sm:$0xff]   ;;  %v1507_v10 = vld [vmem:[%s1878_s1 + $0x18] sm:$0xff]  }
   0x4   :  { %1327 = vmatprep.subr.bf16.mxu0 %v1576_v2  ;;  %1341 = vmatprep.mubr.msk.bf16.mxu0 %vm1577_vm0, %v1576_v2 }
   0x5   :  { %1346 = vmatpush3.bf16.msra.mxu1 %v1658_v6 }
   0x6   :  { %45 = vperm.xlu0 %1502, %v38_v4   ;;  %1347 = vmatprep.subr.bf16.mxu1 %v1576_v2 }
   0x7   :  { %1328 = vmatpush3.bf16.msra.mxu0 %v1504_v5 }
   0x8   :  { %1329 = vmatprep.subr.bf16.mxu0 %v1576_v2 }
   0x9   :  { %1348 = vmatpush3.bf16.msra.mxu1 %v1668_v8 }
   0xa   :  { %1353 = vmatprep.subr.bf16.mxu1 %v1576_v2 }
   0xb   :  { %1330 = vmatpush3.bf16.msra.mxu0 %v1505_v7 }
   0xc   :  { %1331 = vmatprep.subr.bf16.mxu0 %v1576_v2  ;;  %1350 = vmatmul.mubr.bf16.vlgmr.msra.gmra.mxu1 %v1575_v1 }
   0xd   :  { %1354 = vmatpush3.bf16.msra.mxu1 %v1658_v6 }
   0xf   :  { %1332 = vmatpush3.bf16.msra.mxu0 %v1506_v9 }
  0x10   :  { %1333 = vmatprep.subr.bf16.mxu0 %v1576_v2 }
  0x11   :  { %15 = vsyncpa [#allocation4], 0  ;;  %1355 = vmatprep.subr.bf16.mxu1 %v1576_v2  ;;  %1357 = vmatprep.mubr.msk.bf16.mxu1 %vm1577_vm0, %v1576_v2  ;;  %v1509_v11 = vld [vmem:[%s1878_s1 + $0x10] sm:$0xff]   ;;  %v1511_v12 = vld [vmem:[%s1878_s1 + $0x8] sm:$0xff]   ;;  %v39_v14 = vlaneseq  ;;  %v1578_v18 = vmov 1.0|1.0  }
  0x12   :  { %1356 = vmatpush3.bf16.msra.mxu1 %v1668_v8  ;;  %v1512_v13 = vld [vmem:[%s1878_s1] sm:$0xff]   ;;  %vm221_vm4 = vcmask 254976   ;;  %vm175_vm5 = vcmask 261120   ;;  %vm272_vm6 = vcmask 257026   ;;  %vm325_vm7 = vcmask 259076   ;;  %s1579_s30 = smov [#allocation3]  }
  0x13   :  { %1334 = vmatpush3.bf16.msra.mxu0 %v1507_v10  ;;  %1361 = vmatprep.subr.bf16.mxu1 %v1576_v2  ;;  %v40_v16 = vand.u32 127, %v39_v14  ;;  %vm378_vm8 = vcmask 261126   ;;  %vm1201_vm9 = vcmask 9216  }
  0x14   :  { %1335 = vmatprep.subr.bf16.mxu0 %v1576_v2 }
  0x17   :  { %1336 = vmatpush3.bf16.msra.mxu0 %v1509_v11 }
  0x18   :  { %1337 = vmatprep.subr.bf16.mxu0 %v1576_v2 }
  0x1b   :  { %1338 = vmatpush3.bf16.msra.mxu0 %v1511_v12 }
  0x1c   :  { %1339 = vmatprep.subr.bf16.mxu0 %v1576_v2 }
  0x1f   :  { %1340 = vmatpush3.bf16.msra.mxu0 %v1512_v13 }
  0x20   :  { %1377 = vmatprep.subr.bf16.mxu0 %v1576_v2 }
  0x7d   :  { %v43_v15 = vpop.permute.xlu0 %42 }
  0x7e   :  { %vm47_vm1 = vcmp.eq.s32.totalorder %v43_v15, %v40_v16 }
  0x81   :  { %v46_v17 = vpop.permute.xlu0 %45 }
  0x82   :  { %vm48_vm2 = vcmp.eq.s32.totalorder %v46_v17, %v40_v16 }
  0x83   :  { %vm1227_vm3 = vmpackc.low %vm48_vm2, %vm47_vm1 }
  0x84   :  { %1342 = vmatmul.mubr.msk.bf16.vlgmr.msra.gmra.mxu0 %vm1227_vm3, %v1578_v18 }
  0x85   :  { %1378 = vmatpush3.bf16.msra.mxu0 %v1658_v6  ;;  %1381 = vmatprep.mubr.msk.bf16.mxu0 %vm1577_vm0, %v1576_v2 }
  0x86   :  { %1379 = vmatprep.subr.bf16.mxu0 %v1576_v2 }
  0x89   :  { %1380 = vmatpush3.bf16.msra.mxu0 %v1668_v8 }
  0x8a   :  { %1393 = vmatprep.subr.bf16.mxu0 %v1576_v2 }
  0xcc   :  { %v213_v19 = vpop.f32.mrf.mxu1 }
  0xce   :  { %v1351_v20 = vpop.f32.mrf.mxu1 }
  0xcf   :  { %v1763_v20 = vld [vmem:[%s1882_s5 + $0x8] sm:$0xff]  }
  0xd0   :  { %v216_v21 = vpop.f32.mrf.mxu1 }
  0xd1   :  { %v1514_v21 = vld [vmem:[%s1880_s3 + $0x8] sm:$0xff]  }
  0xd2   :  { %v1352_v22 = vpop.f32.mrf.mxu1 }
  0xd3   :  { %v1773_v22 = vld [vmem:[%s1882_s5] sm:$0xff]  }
 0x144   :  { %v152_v23 = vpop.f32.mrf.mxu0 }
 0x145   :  { %v219_v24 = vadd.f32 %v213_v19, %v152_v23 }
 0x146   :  { %v1343_v25 = vpop.f32.mrf.mxu0 }
 0x147   :  { %1521 = vtanh.f32 %v219_v24 }
 0x148   :  { %v1707_v26 = vpop.f32.mrf.mxu0 }
 0x14a   :  { %v1344_v27 = vpop.f32.mrf.mxu0 }
 0x154   :  { %v1522_v28 = vpop.eup %1521 }
 0x155   :  { %v223_v29 = vpack.c.bf16 %v1522_v28, %v1522_v28  ;;  %222 = vst.msk [vmem:[#allocation2] sm:$0x3] %vm221_vm4, %v1522_v28 }
 0x157   :  { %1358 = vmatmul.mubr.msk.bf16.vlgmr.msra.gmra.mxu1 %vm175_vm5, %v223_v29 }
 0x158   :  { %1362 = vmatpush3.bf16.msra.mxu1 %v1658_v6  ;;  %1365 = vmatprep.mubr.msk.bf16.mxu1 %vm1577_vm0, %v1576_v2 }
 0x159   :  { %1363 = vmatprep.subr.bf16.mxu1 %v1576_v2 }
 0x15c   :  { %1364 = vmatpush3.bf16.msra.mxu1 %v1668_v8 }
 0x15d   :  { %1369 = vmatprep.subr.bf16.mxu1 %v1576_v2 }
 0x217   :  { %v261_v30 = vpop.f32.mrf.mxu1 }
 0x218   :  { %v268_v31 = vrot.slane %v261_v30, 6 }
 0x219   :  { %v1359_v32 = vpop.f32.mrf.mxu1 }
 0x21a   :  { %v270_v33 = vadd.f32 %v268_v31, %v152_v23 }
 0x21b   :  { %v264_v34 = vpop.f32.mrf.mxu1 }
 0x21c   :  { %1523 = vtanh.f32 %v270_v33 }
 0x21d   :  { %v1360_v35 = vpop.f32.mrf.mxu1 }
 0x229   :  { %v1524_v36 = vpop.eup %1523 }
 0x22a   :  { %273 = vst.msk [vmem:[#allocation2] sm:$0xc] %vm272_vm6, %v1524_v36  ;;  %v274_v37 = vpack.c.bf16 %v1524_v36, %v1524_v36 }
 0x22c   :  { %v276_v38 = vrot.slane %v274_v37, 1  ;;  %v1238_v37 = vld [vmem:[%s1881_s4] ss:$0 sm:$0xff] }
 0x22e   :  { %1366 = vmatmul.mubr.msk.bf16.vlgmr.msra.gmra.mxu1 %vm175_vm5, %v276_v38 }
 0x22f   :  { %1370 = vmatpush3.bf16.msra.mxu1 %v1658_v6  ;;  %1373 = vmatprep.mubr.msk.bf16.mxu1 %vm1577_vm0, %v1576_v2 }
 0x230   :  { %1371 = vmatprep.subr.bf16.mxu1 %v1576_v2 }
 0x233   :  { %1372 = vmatpush3.bf16.msra.mxu1 %v1668_v8 }
 0x234   :  { %1385 = vmatprep.subr.bf16.mxu1 %v1576_v2 }
 0x2ee   :  { %v314_v39 = vpop.f32.mrf.mxu1 }
 0x2ef   :  { %v321_v40 = vrot.slane %v314_v39, 4 }
 0x2f0   :  { %v1367_v41 = vpop.f32.mrf.mxu1 }
 0x2f1   :  { %v323_v42 = vadd.f32 %v321_v40, %v152_v23 }
 0x2f2   :  { %v317_v43 = vpop.f32.mrf.mxu1 }
 0x2f3   :  { %1525 = vtanh.f32 %v323_v42 }
 0x2f4   :  { %v1368_v44 = vpop.f32.mrf.mxu1 }
 0x300   :  { %v1526_v45 = vpop.eup %1525 }
 0x301   :  { %326 = vst.msk [vmem:[#allocation2] sm:$0x30] %vm325_vm7, %v1526_v45  ;;  %v327_v46 = vpack.c.bf16 %v1526_v45, %v1526_v45 }
 0x303   :  { %v329_v47 = vrot.slane %v327_v46, 2 }
 0x305   :  { %1374 = vmatmul.mubr.msk.bf16.vlgmr.msra.gmra.mxu1 %vm175_vm5, %v329_v47 }
 0x306   :  { %1386 = vmatpush3.bf16.msra.mxu1 %v1658_v6  ;;  %1389 = vmatprep.mubr.msk.bf16.mxu1 %vm1577_vm0, %v1576_v2 }
 0x307   :  { %1387 = vmatprep.subr.bf16.mxu1 %v1576_v2 }
 0x30a   :  { %1388 = vmatpush3.bf16.msra.mxu1 %v1668_v8 }
 0x30b   :  { %1401 = vmatprep.subr.bf16.mxu1 %v1576_v2 }
 0x3c5   :  { %v367_v48 = vpop.f32.mrf.mxu1 }
 0x3c6   :  { %v374_v49 = vrot.slane %v367_v48, 2 }
 0x3c7   :  { %v1375_v50 = vpop.f32.mrf.mxu1 }
 0x3c8   :  { %v376_v51 = vadd.f32 %v374_v49, %v152_v23  ;;  %v1516_v23 = vld [vmem:[%s1880_s3] sm:$0xff]  }
 0x3c9   :  { %v370_v52 = vpop.f32.mrf.mxu1 }
 0x3ca   :  { %1527 = vtanh.f32 %v376_v51 }
 0x3cb   :  { %v1376_v53 = vpop.f32.mrf.mxu1 }
 0x3d7   :  { %v1528_v54 = vpop.eup %1527 }
 0x3d8   :  { %379 = vst.msk [vmem:[#allocation2] sm:$0xc0] %vm378_vm8, %v1528_v54  ;;  %v380_v55 = vpack.c.bf16 %v1528_v54, %v1528_v54 }
 0x3da   :  { %v382_v56 = vrot.slane %v380_v55, 3 }
 0x3dc   :  { %1382 = vmatmul.mubr.msk.bf16.vlgmr.msra.gmra.mxu0 %vm175_vm5, %v382_v56 }
 0x3dd   :  { %1394 = vmatpush3.bf16.msra.mxu0 %v1658_v6  ;;  %1397 = vmatprep.mubr.msk.bf16.mxu0 %vm1577_vm0, %v1576_v2 }
 0x3de   :  { %1395 = vmatprep.subr.bf16.mxu0 %v1576_v2 }
 0x3df   :  { %v584_v31 = vld [vmem:[#allocation2] sm:$0xff] }
 0x3e1   :  { %1396 = vmatpush3.bf16.msra.mxu0 %v1668_v8 }
 0x3e2   :  { %1409 = vmatprep.subr.bf16.mxu0 %v1576_v2 }
 0x49c   :  { %v420_v57 = vpop.f32.mrf.mxu0 }
 0x49d   :  { %v426_v58 = vadd.f32 %v420_v57, %v1707_v26 }
 0x49e   :  { %v1383_v59 = vpop.f32.mrf.mxu0 }
 0x49f   :  { %1529 = vtanh.f32 %v426_v58 }
 0x4a0   :  { %v423_v60 = vpop.f32.mrf.mxu0 }
 0x4a2   :  { %v1384_v61 = vpop.f32.mrf.mxu0 }
 0x4ac   :  { %v1530_v62 = vpop.eup %1529 }
 0x4ad   :  { %428 = vst.msk [vmem:[#allocation2 + $0x8] sm:$0x3] %vm221_vm4, %v1530_v62  ;;  %v429_v63 = vpack.c.bf16 %v1530_v62, %v1530_v62 }
 0x4af   :  { %1390 = vmatmul.mubr.msk.bf16.vlgmr.msra.gmra.mxu1 %vm175_vm5, %v429_v63 }
 0x4b0   :  { %1402 = vmatpush3.bf16.msra.mxu1 %v1658_v6  ;;  %1405 = vmatprep.mubr.msk.bf16.mxu1 %vm1577_vm0, %v1576_v2 }
 0x4b1   :  { %1403 = vmatprep.subr.bf16.mxu1 %v1576_v2 }
 0x4b4   :  { %1404 = vmatpush3.bf16.msra.mxu1 %v1668_v8 }
 0x4b5   :  { %1417 = vmatprep.subr.bf16.mxu1 %v1576_v2 }
 0x56f   :  { %v467_v0 = vpop.f32.mrf.mxu1 }
 0x570   :  { %v474_v3 = vrot.slane %v467_v0, 6 }
 0x571   :  { %v1391_v4 = vpop.f32.mrf.mxu1 }
 0x572   :  { %v476_v5 = vadd.f32 %v474_v3, %v1707_v26 }
 0x573   :  { %v470_v7 = vpop.f32.mrf.mxu1 }
 0x574   :  { %1531 = vtanh.f32 %v476_v5 }
 0x575   :  { %v1392_v9 = vpop.f32.mrf.mxu1 }
 0x581   :  { %v1532_v10 = vpop.eup %1531 }
 0x582   :  { %478 = vst.msk [vmem:[#allocation2 + $0x8] sm:$0xc] %vm272_vm6, %v1532_v10  ;;  %v479_v6 = vpack.c.bf16 %v1532_v10, %v1532_v10 }
 0x584   :  { %v481_v11 = vrot.slane %v479_v6, 1 }
 0x586   :  { %1398 = vmatmul.mubr.msk.bf16.vlgmr.msra.gmra.mxu0 %vm175_vm5, %v481_v11 }
 0x587   :  { %1413 = vmatprep.mubr.msk.bf16.mxu0 %vm1577_vm0, %v1576_v2  ;;  %1410 = vmatpush3.bf16.msra.mxu0 %v1514_v21 }
 0x588   :  { %1411 = vmatprep.subr.bf16.mxu0 %v1576_v2 }
 0x58b   :  { %1412 = vmatpush3.bf16.msra.mxu0 %v1516_v23 }
 0x58c   :  { %1425 = vmatprep.subr.bf16.mxu0 %v1576_v2 }
 0x646   :  { %v519_v8 = vpop.f32.mrf.mxu0 }
 0x647   :  { %v526_v12 = vrot.slane %v519_v8, 4 }
 0x648   :  { %v1399_v13 = vpop.f32.mrf.mxu0 }
 0x649   :  { %v528_v14 = vadd.f32 %v526_v12, %v1707_v26 }
 0x64a   :  { %v522_v15 = vpop.f32.mrf.mxu0 }
 0x64b   :  { %1533 = vtanh.f32 %v528_v14 }
 0x64c   :  { %v1400_v16 = vpop.f32.mrf.mxu0 }
 0x658   :  { %v1534_v17 = vpop.eup %1533 }
 0x659   :  { %530 = vst.msk [vmem:[#allocation2 + $0x8] sm:$0x30] %vm325_vm7, %v1534_v17  ;;  %v531_v18 = vpack.c.bf16 %v1534_v17, %v1534_v17 }
 0x65b   :  { %v533_v19 = vrot.slane %v531_v18, 2 }
 0x65d   :  { %1406 = vmatmul.mubr.msk.bf16.vlgmr.msra.gmra.mxu1 %vm175_vm5, %v533_v19 }
 0x65e   :  { %1421 = vmatprep.mubr.msk.bf16.mxu1 %vm1577_vm0, %v1576_v2  ;;  %1418 = vmatpush3.bf16.msra.mxu1 %v1763_v20 }
 0x65f   :  { %1419 = vmatprep.subr.bf16.mxu1 %v1576_v2 }
 0x662   :  { %1420 = vmatpush3.bf16.msra.mxu1 %v1773_v22 }
 0x663   :  { %1433 = vmatprep.subr.bf16.mxu1 %v1576_v2 }
 0x665   :  { %1422 = vmatmul.mubr.bf16.vlgmr.msra.gmra.mxu1 %v1575_v1 }
 0x666   :  { %1434 = vmatpush3.bf16.msra.mxu1 %v1763_v20  ;;  %1437 = vmatprep.mubr.msk.bf16.mxu1 %vm1577_vm0, %v1576_v2 }
 0x667   :  { %1435 = vmatprep.subr.bf16.mxu1 %v1576_v2 }
 0x66a   :  { %1436 = vmatpush3.bf16.msra.mxu1 %v1773_v22 }
 0x66b   :  { %1449 = vmatprep.subr.bf16.mxu1 %v1576_v2 }
 0x71d   :  { %v571_v24 = vpop.f32.mrf.mxu1 }
 0x71e   :  { %v578_v25 = vrot.slane %v571_v24, 2 }
 0x71f   :  { %v1407_v27 = vpop.f32.mrf.mxu1 }
 0x720   :  { %v580_v28 = vadd.f32 %v578_v25, %v1707_v26 }
 0x721   :  { %v574_v29 = vpop.f32.mrf.mxu1 }
 0x722   :  { %1535 = vtanh.f32 %v580_v28 }
 0x723   :  { %v1408_v1 = vpop.f32.mrf.mxu1 }
 0x725   :  { %v704_v26 = vpop.f32.mrf.mxu1 }
 0x727   :  { %v1423_v34 = vpop.f32.mrf.mxu1 }
 0x729   :  { %v707_v35 = vpop.f32.mrf.mxu1 }
 0x72b   :  { %v1424_v36 = vpop.f32.mrf.mxu1 }
 0x72f   :  { %v1790_v30 = vpop.eup %1535 }
 0x730   :  { %582 = vst.msk [vmem:[#allocation2 + $0x8] sm:$0xc0] %vm378_vm8, %v1790_v30 }
 0x737   :  { %v585_v32 = vld [vmem:[#allocation2 + $0x8] sm:$0xff] }
 0x738   :  { %v586_v33 = vpack.c.bf16 %v585_v32, %v584_v31 }
 0x73a   :  { %1414 = vmatmul.mubr.msk.bf16.vlgmr.msra.gmra.mxu0 %vm175_vm5, %v586_v33 }
 0x73b   :  { %1426 = vmatpush3.bf16.msra.mxu0 %v1763_v20  ;;  %1429 = vmatprep.mubr.msk.bf16.mxu0 %vm1577_vm0, %v1576_v2 }
 0x73c   :  { %1427 = vmatprep.subr.bf16.mxu0 %v1576_v2 }
 0x73f   :  { %1428 = vmatpush3.bf16.msra.mxu0 %v1773_v22 }
 0x740   :  { %1441 = vmatprep.subr.bf16.mxu0 %v1576_v2 }
 0x7fa   :  { %v647_v38 = vpop.f32.mrf.mxu0 }
 0x7fb   :  { %v648_v39 = vadd.f32 %v1238_v37, %v647_v38  ;;  %v1518_v38 = vld [vmem:[%s1883_s6] sm:$0xff]  }
 0x7fc   :  { %v1415_v40 = vpop.f32.mrf.mxu0 }
 0x7fd   :  { %v710_v41 = vadd.f32 %v704_v26, %v648_v39 }
 0x7fe   :  { %v650_v42 = vpop.f32.mrf.mxu0 }
 0x7ff   :  { %1537 = vtanh.f32 %v710_v41  ;;  %v1804_v43 = vadd.f32 %v1238_v37, %v650_v42  ;;  %v1517_v37 = vld [vmem:[%s1883_s6 + $0x8] sm:$0xff]  }
 0x800   :  { %v1416_v44 = vpop.f32.mrf.mxu0 }
 0x80c   :  { %v1538_v45 = vpop.eup %1537 }
 0x80d   :  { %v712_v46 = vpack.c.bf16 %v1538_v45, %v1538_v45 }
 0x80f   :  { %1430 = vmatmul.mubr.msk.bf16.vlgmr.msra.gmra.mxu0 %vm175_vm5, %v712_v46 }
 0x810   :  { %1442 = vmatpush3.bf16.msra.mxu0 %v1763_v20  ;;  %1445 = vmatprep.mubr.msk.bf16.mxu0 %vm1577_vm0, %v1576_v2 }
 0x811   :  { %1443 = vmatprep.subr.bf16.mxu0 %v1576_v2 }
 0x814   :  { %1444 = vmatpush3.bf16.msra.mxu0 %v1773_v22 }
 0x815   :  { %1457 = vmatprep.subr.bf16.mxu0 %v1576_v2 }
 0x8cf   :  { %v750_v47 = vpop.f32.mrf.mxu0 }
 0x8d0   :  { %v757_v48 = vrot.slane %v750_v47, 6 }
 0x8d1   :  { %v1431_v49 = vpop.f32.mrf.mxu0 }
 0x8d2   :  { %v759_v50 = vadd.f32 %v757_v48, %v648_v39 }
 0x8d3   :  { %v753_v51 = vpop.f32.mrf.mxu0 }
 0x8d4   :  { %1539 = vtanh.f32 %v759_v50 }
 0x8d5   :  { %v1432_v52 = vpop.f32.mrf.mxu0 }
 0x8e1   :  { %v1540_v53 = vpop.eup %1539 }
 0x8e2   :  { %v761_v54 = vpack.c.bf16 %v1540_v53, %v1540_v53 }
 0x8e4   :  { %v763_v55 = vrot.slane %v761_v54, 1 }
 0x8e6   :  { %1438 = vmatmul.mubr.msk.bf16.vlgmr.msra.gmra.mxu1 %vm175_vm5, %v763_v55 }
 0x8e7   :  { %1450 = vmatpush3.bf16.msra.mxu1 %v1763_v20  ;;  %1453 = vmatprep.mubr.msk.bf16.mxu1 %vm1577_vm0, %v1576_v2 }
 0x8e8   :  { %1451 = vmatprep.subr.bf16.mxu1 %v1576_v2 }
 0x8eb   :  { %1452 = vmatpush3.bf16.msra.mxu1 %v1773_v22 }
 0x8ec   :  { %1465 = vmatprep.subr.bf16.mxu1 %v1576_v2 }
 0x9a6   :  { %v801_v56 = vpop.f32.mrf.mxu1 }
 0x9a7   :  { %v808_v57 = vrot.slane %v801_v56, 4 }
 0x9a8   :  { %v1439_v58 = vpop.f32.mrf.mxu1 }
 0x9a9   :  { %v810_v59 = vadd.f32 %v808_v57, %v648_v39  ;;  %v1255_v58 = vld [vmem:[%s1886_s9] ss:$0 sm:$0xff] }
 0x9aa   :  { %v804_v60 = vpop.f32.mrf.mxu1 }
 0x9ab   :  { %1541 = vtanh.f32 %v810_v59 }
 0x9ac   :  { %v1440_v61 = vpop.f32.mrf.mxu1 }
 0x9b8   :  { %v1542_v62 = vpop.eup %1541 }
 0x9b9   :  { %v812_v63 = vpack.c.bf16 %v1542_v62, %v1542_v62 }
 0x9bb   :  { %v814_v0 = vrot.slane %v812_v63, 2 }
 0x9bd   :  { %1446 = vmatmul.mubr.msk.bf16.vlgmr.msra.gmra.mxu0 %vm175_vm5, %v814_v0 }
 0x9be   :  { %1458 = vmatpush3.bf16.msra.mxu0 %v1763_v20  ;;  %1461 = vmatprep.mubr.msk.bf16.mxu0 %vm1577_vm0, %v1576_v2 }
 0x9bf   :  { %1459 = vmatprep.subr.bf16.mxu0 %v1576_v2 }
 0x9c2   :  { %1460 = vmatpush3.bf16.msra.mxu0 %v1773_v22 }
 0x9c3   :  { %1473 = vmatprep.subr.bf16.mxu0 %v1576_v2 }
 0xa7d   :  { %v852_v3 = vpop.f32.mrf.mxu0 }
 0xa7e   :  { %v859_v4 = vrot.slane %v852_v3, 2 }
 0xa7f   :  { %v1447_v5 = vpop.f32.mrf.mxu0 }
 0xa80   :  { %v861_v7 = vadd.f32 %v859_v4, %v648_v39  ;;  %v1519_v39 = vld [vmem:[%s1885_s8 + $0x8] sm:$0xff]  }
 0xa81   :  { %v855_v9 = vpop.f32.mrf.mxu0 }
 0xa82   :  { %1543 = vtanh.f32 %v861_v7 }
 0xa83   :  { %v1448_v10 = vpop.f32.mrf.mxu0 }
 0xa8f   :  { %v1544_v6 = vpop.eup %1543 }
 0xa90   :  { %v863_v11 = vpack.c.bf16 %v1544_v6, %v1544_v6 }
 0xa92   :  { %v865_v8 = vrot.slane %v863_v11, 3 }
 0xa94   :  { %1454 = vmatmul.mubr.msk.bf16.vlgmr.msra.gmra.mxu1 %vm175_vm5, %v865_v8 }
 0xa95   :  { %1466 = vmatpush3.bf16.msra.mxu1 %v1763_v20  ;;  %1469 = vmatprep.mubr.msk.bf16.mxu1 %vm1577_vm0, %v1576_v2 }
 0xa96   :  { %1467 = vmatprep.subr.bf16.mxu1 %v1576_v2 }
 0xa99   :  { %1468 = vmatpush3.bf16.msra.mxu1 %v1773_v22 }
 0xa9a   :  { %1481 = vmatprep.subr.bf16.mxu1 %v1576_v2 }
 0xb54   :  { %v903_v12 = vpop.f32.mrf.mxu1 }
 0xb55   :  { %v909_v13 = vadd.f32 %v903_v12, %v1804_v43 }
 0xb56   :  { %v1455_v14 = vpop.f32.mrf.mxu1 }
 0xb57   :  { %1545 = vtanh.f32 %v909_v13 }
 0xb58   :  { %v906_v15 = vpop.f32.mrf.mxu1 }
 0xb5a   :  { %v1456_v16 = vpop.f32.mrf.mxu1 }
 0xb64   :  { %v1546_v17 = vpop.eup %1545 }
 0xb65   :  { %v911_v18 = vpack.c.bf16 %v1546_v17, %v1546_v17 }
 0xb67   :  { %1462 = vmatmul.mubr.msk.bf16.vlgmr.msra.gmra.mxu0 %vm175_vm5, %v911_v18 }
 0xb68   :  { %1474 = vmatpush3.bf16.msra.mxu0 %v1763_v20  ;;  %1477 = vmatprep.mubr.msk.bf16.mxu0 %vm1577_vm0, %v1576_v2 }
 0xb69   :  { %1475 = vmatprep.subr.bf16.mxu0 %v1576_v2 }
 0xb6c   :  { %1476 = vmatpush3.bf16.msra.mxu0 %v1773_v22 }
 0xb6d   :  { %1489 = vmatprep.subr.bf16.mxu0 %v1576_v2 }
 0xc27   :  { %v949_v19 = vpop.f32.mrf.mxu0 }
 0xc28   :  { %v956_v21 = vrot.slane %v949_v19, 6 }
 0xc29   :  { %v1463_v23 = vpop.f32.mrf.mxu0 }
 0xc2a   :  { %v958_v24 = vadd.f32 %v956_v21, %v1804_v43 }
 0xc2b   :  { %v952_v25 = vpop.f32.mrf.mxu0 }
 0xc2c   :  { %1547 = vtanh.f32 %v958_v24 }
 0xc2d   :  { %v1464_v27 = vpop.f32.mrf.mxu0 }
 0xc39   :  { %v1548_v28 = vpop.eup %1547 }
 0xc3a   :  { %v960_v29 = vpack.c.bf16 %v1548_v28, %v1548_v28 }
 0xc3c   :  { %v962_v20 = vrot.slane %v960_v29, 1 }
 0xc3e   :  { %1470 = vmatmul.mubr.msk.bf16.vlgmr.msra.gmra.mxu1 %vm175_vm5, %v962_v20 }
 0xc3f   :  { %1485 = vmatprep.mubr.msk.bf16.mxu1 %vm1577_vm0, %v1576_v2  ;;  %1482 = vmatpush3.bf16.msra.mxu1 %v1517_v37 }
 0xc40   :  { %1483 = vmatprep.subr.bf16.mxu1 %v1576_v2 }
 0xc43   :  { %1484 = vmatpush3.bf16.msra.mxu1 %v1518_v38 }
 0xcfe   :  { %v1000_v1 = vpop.f32.mrf.mxu1 }
 0xcff   :  { %v1007_v22 = vrot.slane %v1000_v1, 4 }
 0xd00   :  { %v1471_v31 = vpop.f32.mrf.mxu1 }
 0xd01   :  { %v1009_v32 = vadd.f32 %v1007_v22, %v1804_v43 }
 0xd02   :  { %v1003_v33 = vpop.f32.mrf.mxu1 }
 0xd03   :  { %1549 = vtanh.f32 %v1009_v32 }
 0xd04   :  { %v1472_v26 = vpop.f32.mrf.mxu1 }
 0xd10   :  { %v1550_v34 = vpop.eup %1549 }
 0xd11   :  { %v1011_v35 = vpack.c.bf16 %v1550_v34, %v1550_v34 }
 0xd13   :  { %v1013_v36 = vrot.slane %v1011_v35, 2 }
 0xd15   :  { %1478 = vmatmul.mubr.msk.bf16.vlgmr.msra.gmra.mxu0 %vm175_vm5, %v1013_v36 }
 0xd16   :  { %1493 = vmatprep.mubr.msk.bf16.mxu0 %vm1577_vm0, %v1576_v2  ;;  %1490 = vmatpush3.bf16.msra.mxu0 %v1519_v39 }
 0xd17   :  { %1491 = vmatprep.subr.bf16.mxu0 %v1576_v2  ;;  %v1520_v2 = vld [vmem:[%s1885_s8] sm:$0xff]   ;;  %s1209_s8 = sshll.u32 %s1579_s30, 4  ;;  %s1210_s8 = int_to_ptr.vmem [resolvable:$true] %s1209_s8 }
 0xd18   :  { %p1558_p1 = scmp.lt.s32.totalorder %s1210_s8, %s1210_s8 }
 0xd1a   :  { %1492 = vmatpush3.bf16.msra.mxu0 %v1520_v2 }
 0xdd5   :  { %v1051_v40 = vpop.f32.mrf.mxu0 }
 0xdd6   :  { %v1058_v41 = vrot.slane %v1051_v40, 2 }
 0xdd7   :  { %v1479_v42 = vpop.f32.mrf.mxu0 }
 0xdd8   :  { %v1060_v44 = vadd.f32 %v1058_v41, %v1804_v43  ;;  %v1251_v43 = vld [vmem:[%s1884_s7] ss:$0 sm:$0xff]  ;;  %s1553_s7 = scalar_lea.vmem %s1210_s8, 32 }
 0xdd9   :  { %v1054_v45 = vpop.f32.mrf.mxu0  ;;  %p1554_p0 = scmp.ne.s32.totalorder %s1210_s8, %s1553_s7  ;;  %p1559_p2 = scmp.lt.s32.totalorder %s1553_s7, %s1553_s7 }
 0xdda   :  { %1551 = vtanh.f32 %v1060_v44 }
 0xddb   :  { %v1480_v46 = vpop.f32.mrf.mxu0  ;;  %p1560_p3 = por %p1559_p2, %p1558_p1 }
 0xddd   :  { %p1561_p4 = pnand %p1560_p3, %p1554_p0 }
 0xde7   :  { %v1552_v47 = vpop.eup %1551 }
 0xde8   :  { %v1062_v48 = vadd.f32 %v1552_v47, %v1790_v30 }
 0xdea   :  { %v1063_v49 = vmul.f32 0.5, %v1062_v48 }
 0xdec   :  { %v1064_v50 = vpack.c.bf16 %v1063_v49, %v1063_v49 }
 0xdee   :  { %v1077_v51 = vrot.slane %v1064_v50, 3 }
 0xdf0   :  { %1486 = vmatmul.mubr.msk.bf16.vlgmr.msra.gmra.mxu1 %vm175_vm5, %v1077_v51 }
 0xeb0   :  { %v1127_v52 = vpop.f32.mrf.mxu1 }
 0xeb1   :  { %v1128_v53 = vadd.f32 %v1251_v43, %v1127_v52 }
 0xeb2   :  { %v1487_v54 = vpop.f32.mrf.mxu1 }
 0xeb3   :  { %v1133_v55 = vmax.f32 %v1128_v53, 0.0 }
 0xeb4   :  { %v1130_v56 = vpop.f32.mrf.mxu1 }
 0xeb5   :  { %v1134_v30 = vpack.c.bf16 %v1133_v55, %v1133_v55 }
 0xeb6   :  { %v1488_v57 = vpop.f32.mrf.mxu1 }
 0xeb7   :  { %1494 = vmatmul.mubr.msk.bf16.vlgmr.msra.gmra.mxu0 %vm175_vm5, %v1134_v30 }
 0xf77   :  { %v1195_v59 = vpop.f32.mrf.mxu0 }
 0xf78   :  { %v1196_v60 = vadd.f32 %v1255_v58, %v1195_v59 }
 0xf79   :  { %v1495_v61 = vpop.f32.mrf.mxu0 }
 0xf7a   :  { %1202 = vst.msk [vmem:[#allocation3] sm:$0x3] %vm1201_vm9, %v1196_v60 }
 0xf7b   :  { %v1198_v62 = vpop.f32.mrf.mxu0 }
 0xf7c   :  { %1564 = shalt.err (!%p1561_p4)
}
 0xf7d   :  { %1212 = dma.vmem_to_hbm [thread:$0]  %s1210_s8, 32, %s1887_s10, [#allocation4]   ;;  %v1496_v63 = vpop.f32.mrf.mxu0 }
 0xf7e   :  { %1573 = dma.done.wait [#allocation4], 32  }
 0xf7f   :  { %1574 = vsyncadd [#allocation4], 4294967264 }
 0xf80   :  { %1216 = vsyncpa [#allocation4], 1 }

</bundles_post_ra>
